<compile_context>
chip_gen: v7x
topology: tpu7x:2x2x1
jax: 0.10.0
libtpu: 0.0.40
codegen_flags: <defaults>
</compile_context>

<pallas_src>
import math

import jax
import jax.numpy as jnp
from jax import lax
from jax.experimental import pallas as pl
from jax.experimental.pallas import tpu as pltpu


def _round_up(v, m):
    return (v + m - 1) // m * m


def lstm_kernel(x_ref, h0_ref, wx_ref, wh_ref, b_ref, out_ref):
    """x_ref:  (T, Np, D)  bf16   time-major inputs
       h0_ref: (Np, H)     f32
       wx_ref: (D, 4H)     bf16   gate order (f, i, o, g); f/i/o cols * 0.5
       wh_ref: (H, 4H)     bf16   (single-tanh sigmoid trick pre-scale)
       b_ref:  (1, 4H)     f32    same order / scaling
       out_ref:(Np, T*H)   f32    column block t holds h_t (lane-dense)."""
    T, Np, D = x_ref.shape
    H = h0_ref.shape[1]
    G = 4 * H

    # ---- Phase 1: hoisted input projection — one big MXU matmul ----------
    # (T*Np, D) @ (D, 4H) in bf16, f32 accumulation; bias added once.
    x2d = x_ref[...].reshape(T * Np, D)
    pre = jnp.dot(x2d, wx_ref[...], preferred_element_type=jnp.float32)
    pre = pre + b_ref[...]
    pre = pre.reshape(T, Np, G)          # T-major: pre[t] is one (8,128) vreg

    wh = wh_ref[...]                     # bf16 weights, resident across steps

    # Single-tanh sigmoid fixup constants (hoisted out of the loop).
    # sigmoid(a) == 0.5 * tanh(a/2) + 0.5 and the f/i/o columns already carry
    # the 0.5 pre-scale, so one tanh over the whole vreg + one VPU affine
    # yields all four gates.
    lane = lax.broadcasted_iota(jnp.int32, (Np, G), 1)
    is_sig = lane < 3 * H
    scale = jnp.where(is_sig, jnp.float32(0.5), jnp.float32(1.0))
    shift = jnp.where(is_sig, jnp.float32(0.5), jnp.float32(0.0))

    # ---- Phase 2: serial recurrence — only h @ Wh on the critical path ----
    h = h0_ref[...]                      # (Np, H) f32
    c = jnp.zeros((Np, H), jnp.float32)  # c0 = 0 (per module)
    hs = []
    for t in range(T):                   # T is a small compile-time constant
        act = pre[t] + jnp.dot(h.astype(jnp.bfloat16), wh,
                               preferred_element_type=jnp.float32)
        gates = jnp.tanh(act) * scale + shift      # one EUP push for 4 gates
        f_g = gates[:, 0 * H:1 * H]      # forget gate aligned with c's lanes
        i_g = gates[:, 1 * H:2 * H]
        o_g = gates[:, 2 * H:3 * H]
        g_g = gates[:, 3 * H:4 * H]
        c = f_g * c + i_g * g_g
        h = o_g * jnp.tanh(c)
        hs.append(h)

    # Single lane-dense (Np, T*H) store; unpacked to (N, T, H) in the wrapper.
    out_ref[...] = jnp.concatenate(hs, axis=-1).astype(out_ref.dtype)


def lstm_forward(x, h0, Wx, Wh, b):
    """x: (N, T, D), h0: (N, H), Wx: (D, 4H), Wh: (H, 4H), b: (4H,)
    returns hn: (N, T, H) — matches the PyTorch module's forward()."""
    N, T, D = x.shape
    H = h0.shape[1]

    # One-time weight prep (outside the kernel / recurrence):
    #  * reorder gate columns (i,f,o,g) -> (f,i,o,g),
    #  * scale the sigmoid-gate (f,i,o) column groups by 0.5,
    #  * cast pure matmul inputs to bf16 (accumulation stays f32 in-kernel).
    def prep(w):
        wi, wf, wo, wg = jnp.split(w, 4, axis=-1)
        return jnp.concatenate([0.5 * wf, 0.5 * wi, 0.5 * wo, wg], axis=-1)

    Wx_p = prep(Wx).astype(jnp.bfloat16)
    Wh_p = prep(Wh).astype(jnp.bfloat16)
    b_p = prep(b.reshape(1, 4 * H)).astype(jnp.float32)

    # Pad batch to the 8-wide sublane axis; padded rows are zeros, stay finite
    # through the recurrence, and are dropped on the way out.
    Np = _round_up(N, 8)
    if Np != N:
        x = jnp.pad(x, ((0, Np - N), (0, 0), (0, 0)))
        h0 = jnp.pad(h0, ((0, Np - N), (0, 0)))

    # Time-major activations: transpose paid once here so pre[t] in the kernel
    # is a whole vreg every step.
    x_tm = jnp.transpose(x, (1, 0, 2)).astype(jnp.bfloat16)      # (T, Np, D)
    h0_f = h0.astype(jnp.float32)

    vmem = pl.BlockSpec(memory_space=pltpu.MemorySpace.VMEM)
    out = pl.pallas_call(
        lstm_kernel,
        out_shape=jax.ShapeDtypeStruct((Np, T * H), jnp.float32),
        in_specs=[vmem, vmem, vmem, vmem, vmem],
        out_specs=vmem,
    )(x_tm, h0_f, Wx_p, Wh_p, b_p)

    # (Np, T*H) -> (Np, T, H): column block t is h_t, so a plain reshape.
    return out.reshape(Np, T, H)[:N].astype(h0.dtype)


def lstm_reference(x, h0, Wx, Wh, b):
    """Pure-JAX f32 reference mirroring the PyTorch module, for verification."""
    H = h0.shape[1]

    def step(carry, xt):
        h, c = carry
        act = xt @ Wx + h @ Wh + b
        i = jax.nn.sigmoid(act[:, :H])
        f = jax.nn.sigmoid(act[:, H:2 * H])
        o = jax.nn.sigmoid(act[:, 2 * H:3 * H])
        g = jnp.tanh(act[:, 3 * H:])
        c = f * c + i * g
        h = o * jnp.tanh(c)
        return (h, c), h

    (_, _), hs = lax.scan(step, (h0, jnp.zeros_like(h0)),
                          jnp.transpose(x, (1, 0, 2)))
    return jnp.transpose(hs, (1, 0, 2))


if __name__ == "__main__":
    # Small shapes: batch N=2, seq T=8, input D=16, hidden H=32.
    N, T, D, H = 2, 8, 16, 32

    key = jax.random.PRNGKey(0)
    k_wx, k_wh, k_x, k_h0 = jax.random.split(key, 4)

    # Deterministic parameter init matching the module's __init__:
    # Wx ~ randn(D, 4H)/sqrt(D), Wh ~ randn(H, 4H)/sqrt(H), b = zeros(4H)
    Wx = jax.random.normal(k_wx, (D, 4 * H), jnp.float32) / math.sqrt(D)
    Wh = jax.random.normal(k_wh, (H, 4 * H), jnp.float32) / math.sqrt(H)
    b = jnp.zeros((4 * H,), jnp.float32)

    x = jax.random.normal(k_x, (N, T, D), jnp.float32)
    h0 = jax.random.normal(k_h0, (N, H), jnp.float32)

    hn = jax.block_until_ready(lstm_forward(x, h0, Wx, Wh, b))

    hn_ref = lstm_reference(x, h0, Wx, Wh, b)
    assert hn.shape == (N, T, H)
    # bf16 matmul inputs (f32 accumulation / gate math) vs. the pure-f32
    # reference -> tolerance loosened from 1e-5 to 5e-2 per the perf review.
    assert jnp.allclose(hn, hn_ref, atol=5e-2, rtol=0.0), "mismatch vs reference"

    print("KERNEL_OK")
</pallas_src>

<mosaic_0001>
module attributes {stable_mosaic.version = 11 : i64} {
  func.func @lstm_kernel(%arg0: memref<8x8x16xbf16, #tpu.memory_space<vmem>>, %arg1: memref<8x32xf32, #tpu.memory_space<vmem>>, %arg2: memref<16x128xbf16, #tpu.memory_space<vmem>>, %arg3: memref<32x128xbf16, #tpu.memory_space<vmem>>, %arg4: memref<1x128xf32, #tpu.memory_space<vmem>>, %arg5: memref<8x256xf32, #tpu.memory_space<vmem>>) attributes {dimension_semantics = [], scalar_prefetch = 0 : i64, scratch_operands = 0 : i64, tpu.core_type = #tpu.core_type<tc>} {
    %c0 = arith.constant 0 : index
    %c0_0 = arith.constant 0 : index
    %c0_1 = arith.constant 0 : index
    %0 = vector.load %arg0[%c0, %c0_0, %c0_1] : memref<8x8x16xbf16, #tpu.memory_space<vmem>>, vector<8x8x16xbf16>
    %1 = vector.shape_cast %0 : vector<8x8x16xbf16> to vector<64x16xbf16>
    %c0_2 = arith.constant 0 : index
    %c0_3 = arith.constant 0 : index
    %2 = vector.load %arg2[%c0_2, %c0_3] : memref<16x128xbf16, #tpu.memory_space<vmem>>, vector<16x128xbf16>
    %cst = arith.constant dense<0.000000e+00> : vector<64x128xf32>
    %3 = tpu.matmul %1, %2, %cst {dimension_numbers = #tpu.dot_dimension_numbers<[1], [0], [0], [1], [0, 0, 1, 1], [], []>} : vector<64x16xbf16>, vector<16x128xbf16>, vector<64x128xf32> -> vector<64x128xf32>
    %c0_4 = arith.constant 0 : index
    %c0_5 = arith.constant 0 : index
    %4 = vector.load %arg4[%c0_4, %c0_5] : memref<1x128xf32, #tpu.memory_space<vmem>>, vector<1x128xf32>
    %5 = vector.broadcast %4 : vector<1x128xf32> to vector<64x128xf32>
    %6 = arith.addf %3, %5 : vector<64x128xf32>
    %7 = vector.shape_cast %6 : vector<64x128xf32> to vector<8x8x128xf32>
    %c0_6 = arith.constant 0 : index
    %c0_7 = arith.constant 0 : index
    %8 = vector.load %arg3[%c0_6, %c0_7] : memref<32x128xbf16, #tpu.memory_space<vmem>>, vector<32x128xbf16>
    %9 = tpu.iota {dimensions = array<i32: 1>} : vector<8x128xi32>
    %c96_i32 = arith.constant 96 : i32
    %10 = vector.broadcast %c96_i32 : i32 to vector<8x128xi32>
    %11 = arith.cmpi slt, %9, %10 : vector<8x128xi32>
    %cst_8 = arith.constant 5.000000e-01 : f32
    %cst_9 = arith.constant 1.000000e+00 : f32
    %12 = vector.broadcast %cst_8 : f32 to vector<8x128xf32>
    %13 = vector.broadcast %cst_9 : f32 to vector<8x128xf32>
    %14 = arith.select %11, %12, %13 : vector<8x128xi1>, vector<8x128xf32>
    %cst_10 = arith.constant 5.000000e-01 : f32
    %cst_11 = arith.constant 0.000000e+00 : f32
    %15 = vector.broadcast %cst_10 : f32 to vector<8x128xf32>
    %16 = vector.broadcast %cst_11 : f32 to vector<8x128xf32>
    %17 = arith.select %11, %15, %16 : vector<8x128xi1>, vector<8x128xf32>
    %c0_12 = arith.constant 0 : index
    %c0_13 = arith.constant 0 : index
    %18 = vector.load %arg1[%c0_12, %c0_13] : memref<8x32xf32, #tpu.memory_space<vmem>>, vector<8x32xf32>
    %cst_14 = arith.constant 0.000000e+00 : f32
    %19 = vector.broadcast %cst_14 : f32 to vector<8x32xf32>
    %20 = vector.extract_strided_slice %7 {offsets = [0, 0, 0], sizes = [1, 8, 128], strides = [1, 1, 1]} : vector<8x8x128xf32> to vector<1x8x128xf32>
    %21 = vector.shape_cast %20 : vector<1x8x128xf32> to vector<8x128xf32>
    %22 = arith.truncf %18 : vector<8x32xf32> to vector<8x32xbf16>
    %cst_15 = arith.constant dense<0.000000e+00> : vector<8x128xf32>
    %23 = tpu.matmul %22, %8, %cst_15 {dimension_numbers = #tpu.dot_dimension_numbers<[1], [0], [0], [1], [0, 0, 1, 1], [], []>} : vector<8x32xbf16>, vector<32x128xbf16>, vector<8x128xf32> -> vector<8x128xf32>
    %24 = arith.addf %21, %23 : vector<8x128xf32>
    %25 = math.tanh %24 : vector<8x128xf32>
    %26 = arith.mulf %25, %14 : vector<8x128xf32>
    %27 = arith.addf %26, %17 : vector<8x128xf32>
    %28 = vector.extract_strided_slice %27 {offsets = [0, 0], sizes = [8, 32], strides = [1, 1]} : vector<8x128xf32> to vector<8x32xf32>
    %29 = vector.extract_strided_slice %27 {offsets = [0, 32], sizes = [8, 32], strides = [1, 1]} : vector<8x128xf32> to vector<8x32xf32>
    %30 = vector.extract_strided_slice %27 {offsets = [0, 64], sizes = [8, 32], strides = [1, 1]} : vector<8x128xf32> to vector<8x32xf32>
    %31 = vector.extract_strided_slice %27 {offsets = [0, 96], sizes = [8, 32], strides = [1, 1]} : vector<8x128xf32> to vector<8x32xf32>
    %32 = arith.mulf %28, %19 : vector<8x32xf32>
    %33 = arith.mulf %29, %31 : vector<8x32xf32>
    %34 = arith.addf %32, %33 : vector<8x32xf32>
    %35 = math.tanh %34 : vector<8x32xf32>
    %36 = arith.mulf %30, %35 : vector<8x32xf32>
    %37 = vector.extract_strided_slice %7 {offsets = [1, 0, 0], sizes = [1, 8, 128], strides = [1, 1, 1]} : vector<8x8x128xf32> to vector<1x8x128xf32>
    %38 = vector.shape_cast %37 : vector<1x8x128xf32> to vector<8x128xf32>
    %39 = arith.truncf %36 : vector<8x32xf32> to vector<8x32xbf16>
    %cst_16 = arith.constant dense<0.000000e+00> : vector<8x128xf32>
    %40 = tpu.matmul %39, %8, %cst_16 {dimension_numbers = #tpu.dot_dimension_numbers<[1], [0], [0], [1], [0, 0, 1, 1], [], []>} : vector<8x32xbf16>, vector<32x128xbf16>, vector<8x128xf32> -> vector<8x128xf32>
    %41 = arith.addf %38, %40 : vector<8x128xf32>
    %42 = math.tanh %41 : vector<8x128xf32>
    %43 = arith.mulf %42, %14 : vector<8x128xf32>
    %44 = arith.addf %43, %17 : vector<8x128xf32>
    %45 = vector.extract_strided_slice %44 {offsets = [0, 0], sizes = [8, 32], strides = [1, 1]} : vector<8x128xf32> to vector<8x32xf32>
    %46 = vector.extract_strided_slice %44 {offsets = [0, 32], sizes = [8, 32], strides = [1, 1]} : vector<8x128xf32> to vector<8x32xf32>
    %47 = vector.extract_strided_slice %44 {offsets = [0, 64], sizes = [8, 32], strides = [1, 1]} : vector<8x128xf32> to vector<8x32xf32>
    %48 = vector.extract_strided_slice %44 {offsets = [0, 96], sizes = [8, 32], strides = [1, 1]} : vector<8x128xf32> to vector<8x32xf32>
    %49 = arith.mulf %45, %34 : vector<8x32xf32>
    %50 = arith.mulf %46, %48 : vector<8x32xf32>
    %51 = arith.addf %49, %50 : vector<8x32xf32>
    %52 = math.tanh %51 : vector<8x32xf32>
    %53 = arith.mulf %47, %52 : vector<8x32xf32>
    %54 = vector.extract_strided_slice %7 {offsets = [2, 0, 0], sizes = [1, 8, 128], strides = [1, 1, 1]} : vector<8x8x128xf32> to vector<1x8x128xf32>
    %55 = vector.shape_cast %54 : vector<1x8x128xf32> to vector<8x128xf32>
    %56 = arith.truncf %53 : vector<8x32xf32> to vector<8x32xbf16>
    %cst_17 = arith.constant dense<0.000000e+00> : vector<8x128xf32>
    %57 = tpu.matmul %56, %8, %cst_17 {dimension_numbers = #tpu.dot_dimension_numbers<[1], [0], [0], [1], [0, 0, 1, 1], [], []>} : vector<8x32xbf16>, vector<32x128xbf16>, vector<8x128xf32> -> vector<8x128xf32>
    %58 = arith.addf %55, %57 : vector<8x128xf32>
    %59 = math.tanh %58 : vector<8x128xf32>
    %60 = arith.mulf %59, %14 : vector<8x128xf32>
    %61 = arith.addf %60, %17 : vector<8x128xf32>
    %62 = vector.extract_strided_slice %61 {offsets = [0, 0], sizes = [8, 32], strides = [1, 1]} : vector<8x128xf32> to vector<8x32xf32>
    %63 = vector.extract_strided_slice %61 {offsets = [0, 32], sizes = [8, 32], strides = [1, 1]} : vector<8x128xf32> to vector<8x32xf32>
    %64 = vector.extract_strided_slice %61 {offsets = [0, 64], sizes = [8, 32], strides = [1, 1]} : vector<8x128xf32> to vector<8x32xf32>
    %65 = vector.extract_strided_slice %61 {offsets = [0, 96], sizes = [8, 32], strides = [1, 1]} : vector<8x128xf32> to vector<8x32xf32>
    %66 = arith.mulf %62, %51 : vector<8x32xf32>
    %67 = arith.mulf %63, %65 : vector<8x32xf32>
    %68 = arith.addf %66, %67 : vector<8x32xf32>
    %69 = math.tanh %68 : vector<8x32xf32>
    %70 = arith.mulf %64, %69 : vector<8x32xf32>
    %71 = vector.extract_strided_slice %7 {offsets = [3, 0, 0], sizes = [1, 8, 128], strides = [1, 1, 1]} : vector<8x8x128xf32> to vector<1x8x128xf32>
    %72 = vector.shape_cast %71 : vector<1x8x128xf32> to vector<8x128xf32>
    %73 = arith.truncf %70 : vector<8x32xf32> to vector<8x32xbf16>
    %cst_18 = arith.constant dense<0.000000e+00> : vector<8x128xf32>
    %74 = tpu.matmul %73, %8, %cst_18 {dimension_numbers = #tpu.dot_dimension_numbers<[1], [0], [0], [1], [0, 0, 1, 1], [], []>} : vector<8x32xbf16>, vector<32x128xbf16>, vector<8x128xf32> -> vector<8x128xf32>
    %75 = arith.addf %72, %74 : vector<8x128xf32>
    %76 = math.tanh %75 : vector<8x128xf32>
    %77 = arith.mulf %76, %14 : vector<8x128xf32>
    %78 = arith.addf %77, %17 : vector<8x128xf32>
    %79 = vector.extract_strided_slice %78 {offsets = [0, 0], sizes = [8, 32], strides = [1, 1]} : vector<8x128xf32> to vector<8x32xf32>
    %80 = vector.extract_strided_slice %78 {offsets = [0, 32], sizes = [8, 32], strides = [1, 1]} : vector<8x128xf32> to vector<8x32xf32>
    %81 = vector.extract_strided_slice %78 {offsets = [0, 64], sizes = [8, 32], strides = [1, 1]} : vector<8x128xf32> to vector<8x32xf32>
    %82 = vector.extract_strided_slice %78 {offsets = [0, 96], sizes = [8, 32], strides = [1, 1]} : vector<8x128xf32> to vector<8x32xf32>
    %83 = arith.mulf %79, %68 : vector<8x32xf32>
    %84 = arith.mulf %80, %82 : vector<8x32xf32>
    %85 = arith.addf %83, %84 : vector<8x32xf32>
    %86 = math.tanh %85 : vector<8x32xf32>
    %87 = arith.mulf %81, %86 : vector<8x32xf32>
    %88 = vector.extract_strided_slice %7 {offsets = [4, 0, 0], sizes = [1, 8, 128], strides = [1, 1, 1]} : vector<8x8x128xf32> to vector<1x8x128xf32>
    %89 = vector.shape_cast %88 : vector<1x8x128xf32> to vector<8x128xf32>
    %90 = arith.truncf %87 : vector<8x32xf32> to vector<8x32xbf16>
    %cst_19 = arith.constant dense<0.000000e+00> : vector<8x128xf32>
    %91 = tpu.matmul %90, %8, %cst_19 {dimension_numbers = #tpu.dot_dimension_numbers<[1], [0], [0], [1], [0, 0, 1, 1], [], []>} : vector<8x32xbf16>, vector<32x128xbf16>, vector<8x128xf32> -> vector<8x128xf32>
    %92 = arith.addf %89, %91 : vector<8x128xf32>
    %93 = math.tanh %92 : vector<8x128xf32>
    %94 = arith.mulf %93, %14 : vector<8x128xf32>
    %95 = arith.addf %94, %17 : vector<8x128xf32>
    %96 = vector.extract_strided_slice %95 {offsets = [0, 0], sizes = [8, 32], strides = [1, 1]} : vector<8x128xf32> to vector<8x32xf32>
    %97 = vector.extract_strided_slice %95 {offsets = [0, 32], sizes = [8, 32], strides = [1, 1]} : vector<8x128xf32> to vector<8x32xf32>
    %98 = vector.extract_strided_slice %95 {offsets = [0, 64], sizes = [8, 32], strides = [1, 1]} : vector<8x128xf32> to vector<8x32xf32>
    %99 = vector.extract_strided_slice %95 {offsets = [0, 96], sizes = [8, 32], strides = [1, 1]} : vector<8x128xf32> to vector<8x32xf32>
    %100 = arith.mulf %96, %85 : vector<8x32xf32>
    %101 = arith.mulf %97, %99 : vector<8x32xf32>
    %102 = arith.addf %100, %101 : vector<8x32xf32>
    %103 = math.tanh %102 : vector<8x32xf32>
    %104 = arith.mulf %98, %103 : vector<8x32xf32>
    %105 = vector.extract_strided_slice %7 {offsets = [5, 0, 0], sizes = [1, 8, 128], strides = [1, 1, 1]} : vector<8x8x128xf32> to vector<1x8x128xf32>
    %106 = vector.shape_cast %105 : vector<1x8x128xf32> to vector<8x128xf32>
    %107 = arith.truncf %104 : vector<8x32xf32> to vector<8x32xbf16>
    %cst_20 = arith.constant dense<0.000000e+00> : vector<8x128xf32>
    %108 = tpu.matmul %107, %8, %cst_20 {dimension_numbers = #tpu.dot_dimension_numbers<[1], [0], [0], [1], [0, 0, 1, 1], [], []>} : vector<8x32xbf16>, vector<32x128xbf16>, vector<8x128xf32> -> vector<8x128xf32>
    %109 = arith.addf %106, %108 : vector<8x128xf32>
    %110 = math.tanh %109 : vector<8x128xf32>
    %111 = arith.mulf %110, %14 : vector<8x128xf32>
    %112 = arith.addf %111, %17 : vector<8x128xf32>
    %113 = vector.extract_strided_slice %112 {offsets = [0, 0], sizes = [8, 32], strides = [1, 1]} : vector<8x128xf32> to vector<8x32xf32>
    %114 = vector.extract_strided_slice %112 {offsets = [0, 32], sizes = [8, 32], strides = [1, 1]} : vector<8x128xf32> to vector<8x32xf32>
    %115 = vector.extract_strided_slice %112 {offsets = [0, 64], sizes = [8, 32], strides = [1, 1]} : vector<8x128xf32> to vector<8x32xf32>
    %116 = vector.extract_strided_slice %112 {offsets = [0, 96], sizes = [8, 32], strides = [1, 1]} : vector<8x128xf32> to vector<8x32xf32>
    %117 = arith.mulf %113, %102 : vector<8x32xf32>
    %118 = arith.mulf %114, %116 : vector<8x32xf32>
    %119 = arith.addf %117, %118 : vector<8x32xf32>
    %120 = math.tanh %119 : vector<8x32xf32>
    %121 = arith.mulf %115, %120 : vector<8x32xf32>
    %122 = vector.extract_strided_slice %7 {offsets = [6, 0, 0], sizes = [1, 8, 128], strides = [1, 1, 1]} : vector<8x8x128xf32> to vector<1x8x128xf32>
    %123 = vector.shape_cast %122 : vector<1x8x128xf32> to vector<8x128xf32>
    %124 = arith.truncf %121 : vector<8x32xf32> to vector<8x32xbf16>
    %cst_21 = arith.constant dense<0.000000e+00> : vector<8x128xf32>
    %125 = tpu.matmul %124, %8, %cst_21 {dimension_numbers = #tpu.dot_dimension_numbers<[1], [0], [0], [1], [0, 0, 1, 1], [], []>} : vector<8x32xbf16>, vector<32x128xbf16>, vector<8x128xf32> -> vector<8x128xf32>
    %126 = arith.addf %123, %125 : vector<8x128xf32>
    %127 = math.tanh %126 : vector<8x128xf32>
    %128 = arith.mulf %127, %14 : vector<8x128xf32>
    %129 = arith.addf %128, %17 : vector<8x128xf32>
    %130 = vector.extract_strided_slice %129 {offsets = [0, 0], sizes = [8, 32], strides = [1, 1]} : vector<8x128xf32> to vector<8x32xf32>
    %131 = vector.extract_strided_slice %129 {offsets = [0, 32], sizes = [8, 32], strides = [1, 1]} : vector<8x128xf32> to vector<8x32xf32>
    %132 = vector.extract_strided_slice %129 {offsets = [0, 64], sizes = [8, 32], strides = [1, 1]} : vector<8x128xf32> to vector<8x32xf32>
    %133 = vector.extract_strided_slice %129 {offsets = [0, 96], sizes = [8, 32], strides = [1, 1]} : vector<8x128xf32> to vector<8x32xf32>
    %134 = arith.mulf %130, %119 : vector<8x32xf32>
    %135 = arith.mulf %131, %133 : vector<8x32xf32>
    %136 = arith.addf %134, %135 : vector<8x32xf32>
    %137 = math.tanh %136 : vector<8x32xf32>
    %138 = arith.mulf %132, %137 : vector<8x32xf32>
    %139 = vector.extract_strided_slice %7 {offsets = [7, 0, 0], sizes = [1, 8, 128], strides = [1, 1, 1]} : vector<8x8x128xf32> to vector<1x8x128xf32>
    %140 = vector.shape_cast %139 : vector<1x8x128xf32> to vector<8x128xf32>
    %141 = arith.truncf %138 : vector<8x32xf32> to vector<8x32xbf16>
    %cst_22 = arith.constant dense<0.000000e+00> : vector<8x128xf32>
    %142 = tpu.matmul %141, %8, %cst_22 {dimension_numbers = #tpu.dot_dimension_numbers<[1], [0], [0], [1], [0, 0, 1, 1], [], []>} : vector<8x32xbf16>, vector<32x128xbf16>, vector<8x128xf32> -> vector<8x128xf32>
    %143 = arith.addf %140, %142 : vector<8x128xf32>
    %144 = math.tanh %143 : vector<8x128xf32>
    %145 = arith.mulf %144, %14 : vector<8x128xf32>
    %146 = arith.addf %145, %17 : vector<8x128xf32>
    %147 = vector.extract_strided_slice %146 {offsets = [0, 0], sizes = [8, 32], strides = [1, 1]} : vector<8x128xf32> to vector<8x32xf32>
    %148 = vector.extract_strided_slice %146 {offsets = [0, 32], sizes = [8, 32], strides = [1, 1]} : vector<8x128xf32> to vector<8x32xf32>
    %149 = vector.extract_strided_slice %146 {offsets = [0, 64], sizes = [8, 32], strides = [1, 1]} : vector<8x128xf32> to vector<8x32xf32>
    %150 = vector.extract_strided_slice %146 {offsets = [0, 96], sizes = [8, 32], strides = [1, 1]} : vector<8x128xf32> to vector<8x32xf32>
    %151 = arith.mulf %147, %136 : vector<8x32xf32>
    %152 = arith.mulf %148, %150 : vector<8x32xf32>
    %153 = arith.addf %151, %152 : vector<8x32xf32>
    %154 = math.tanh %153 : vector<8x32xf32>
    %155 = arith.mulf %149, %154 : vector<8x32xf32>
    %156 = tpu.concatenate %36, %53, %70, %87, %104, %121, %138, %155 in 1 : vector<8x32xf32>, vector<8x32xf32>, vector<8x32xf32>, vector<8x32xf32>, vector<8x32xf32>, vector<8x32xf32>, vector<8x32xf32>, vector<8x32xf32> -> vector<8x256xf32>
    %c0_23 = arith.constant 0 : index
    %c0_24 = arith.constant 0 : index
    %157 = vector.load %arg5[%c0_23, %c0_24] : memref<8x256xf32, #tpu.memory_space<vmem>>, vector<8x256xf32>
    tpu.vector_store %arg5[%c0_23, %c0_24], %156 {strides = array<i32>} : memref<8x256xf32, #tpu.memory_space<vmem>>, vector<8x256xf32>,
    return
  }
}

</mosaic_0001>

<bundles_post_ra>
// kernel: tpu_custom_call.1
= control target key start
LH: loop header
LB: loop body
LE: loop exit
PB: predicated region body
PF: predicated region fallthrough
CT: control target
= control target key end

     0   :  { %10 = vsyncpa [#allocation3], 0  ;;  %s1406_s0 = inlined_call_operand.hbm [shape: bf16[8,8,16], index: 0, kind: input, shape index: {}]   ;;  %s1407_s1 = inlined_call_operand.hbm [shape: f32[8,32], index: 1, kind: input, shape index: {}]   ;;  %s1408_s2 = inlined_call_operand.hbm [shape: bf16[16,128], index: 2, kind: input, shape index: {}]   ;;  %s1409_s3 = inlined_call_operand.hbm [shape: bf16[32,128], index: 3, kind: input, shape index: {}]   ;;  %s1410_s4 = inlined_call_operand.vmem [shape: f32[1,128], index: 4, kind: input, shape index: {}]   ;;  %s1411_s5 = inlined_call_operand.hbm [shape: f32[8,256], index: 5, kind: output, shape index: {}]  }
   0x1   :  { %11 = vsyncpa [#allocation6], 0 }
   0x2   :  { %12 = vsyncpa [#allocation9], 0 }
   0x3   :  { %13 = vsyncpa [#allocation4], 0  ;;  %s1103_s18 = smov [#allocation5]   ;;  %s1104_s20 = smov [#allocation2]  }
   0x4   :  { %s32_s19 = sshll.u32 %s1103_s18, 4  ;;  %s19_s21 = sshll.u32 %s1104_s20, 4  ;;  %s33_s19 = int_to_ptr.vmem [resolvable:$true] %s32_s19  ;;  %s1145_s21 = int_to_ptr.vmem [resolvable:$true] %s19_s21 }
   0x5   :  { %s985_s24 = scalar_lea.hbm %s1407_s1, 128 }
   0x6   :  { %p986_p0 = scmp.ne.s32.totalorder %s1407_s1, %s985_s24  ;;  %p989_p1 = scmp.lt.u32.totalorder %s985_s24, %s1407_s1 }
   0x8   :  { %p991_p2 = pnand %p989_p1, %p986_p0 }
   0xa   :  { %994 = shalt.err (!%p991_p2)
}
   0xb   :  { %s995_s29 = scalar_lea.vmem %s33_s19, 128  ;;  %p1000_p4 = scmp.lt.s32.totalorder %s33_s19, %s33_s19 }
   0xc   :  { %p996_p3 = scmp.ne.s32.totalorder %s33_s19, %s995_s29  ;;  %p1001_p5 = scmp.lt.s32.totalorder %s995_s29, %s995_s29 }
   0xe   :  { %p1002_p6 = por %p1001_p5, %p1000_p4 }
  0x10   :  { %p1003_p7 = pnand %p1002_p6, %p996_p3 }
  0x12   :  { %1006 = shalt.err (!%p1003_p7)
}
  0x13   :  { %35 = dma.hbm_to_vmem [thread:$0]  %s1407_s1, 128, %s33_s19, [#allocation6]  }
  0x14   :  { %s1007_s9 = scalar_lea.hbm %s1406_s0, 512 }
  0x15   :  { %p1008_p8 = scmp.ne.s32.totalorder %s1406_s0, %s1007_s9  ;;  %p1011_p9 = scmp.lt.u32.totalorder %s1007_s9, %s1406_s0 }
  0x17   :  { %p1013_p10 = pnand %p1011_p9, %p1008_p8 }
  0x19   :  { %1016 = shalt.err (!%p1013_p10)
}
  0x1a   :  { %s1017_s14 = scalar_lea.vmem %s1145_s21, 512  ;;  %p1022_p12 = scmp.lt.s32.totalorder %s1145_s21, %s1145_s21 }
  0x1b   :  { %p1018_p11 = scmp.ne.s32.totalorder %s1145_s21, %s1017_s14  ;;  %p1023_p13 = scmp.lt.s32.totalorder %s1017_s14, %s1017_s14 }
  0x1d   :  { %p1024_p0 = por %p1023_p13, %p1022_p12 }
  0x1f   :  { %p1025_p1 = pnand %p1024_p0, %p1018_p11 }
  0x21   :  { %1028 = shalt.err (!%p1025_p1)
}
  0x22   :  { %s1105_s1 = smov 64   ;;  %s1106_s15 = smov 4  }
  0x23   :  { %25 = dma.hbm_to_vmem [thread:$0]  %s1406_s0, 512, %s1145_s21, [#allocation3], %s1105_s1, %s1105_s1, %s1106_s15  }
  0x24   :  { %s1107_s18 = smov [#allocation7]   ;;  %s1108_s20 = smov [#allocation8]  }
  0x25   :  { %s41_s19 = sshll.u32 %s1107_s18, 4  ;;  %s53_s22 = sshll.u32 %s1108_s20, 4  ;;  %s42_s19 = int_to_ptr.vmem [resolvable:$true] %s41_s19  ;;  %s1179_s22 = int_to_ptr.vmem [resolvable:$true] %s53_s22 }
  0x26   :  { %s1029_s25 = scalar_lea.hbm %s1408_s2, 128 }
  0x27   :  { %p1030_p2 = scmp.ne.s32.totalorder %s1408_s2, %s1029_s25  ;;  %p1033_p3 = scmp.lt.u32.totalorder %s1029_s25, %s1408_s2 }
  0x29   :  { %p1035_p4 = pnand %p1033_p3, %p1030_p2 }
  0x2b   :  { %1038 = shalt.err (!%p1035_p4)
}
  0x2c   :  { %s1039_s0 = scalar_lea.vmem %s42_s19, 128  ;;  %p1044_p6 = scmp.lt.s32.totalorder %s42_s19, %s42_s19 }
  0x2d   :  { %p1040_p5 = scmp.ne.s32.totalorder %s42_s19, %s1039_s0  ;;  %p1045_p7 = scmp.lt.s32.totalorder %s1039_s0, %s1039_s0 }
  0x2f   :  { %p1046_p8 = por %p1045_p7, %p1044_p6 }
  0x31   :  { %p1047_p9 = pnand %p1046_p8, %p1040_p5 }
  0x33   :  { %1050 = shalt.err (!%p1047_p9)
}
  0x34   :  { %47 = dma.hbm_to_vmem [thread:$0]  %s1408_s2, 128, %s42_s19, [#allocation6], %s1105_s1, %s1105_s1, %s1106_s15  }
  0x35   :  { %s1051_s8 = scalar_lea.hbm %s1409_s3, 256 }
  0x36   :  { %p1052_p10 = scmp.ne.s32.totalorder %s1409_s3, %s1051_s8  ;;  %p1055_p11 = scmp.lt.u32.totalorder %s1051_s8, %s1409_s3 }
  0x38   :  { %p1057_p12 = pnand %p1055_p11, %p1052_p10 }
  0x3a   :  { %1060 = shalt.err (!%p1057_p12)
}
  0x3b   :  { %s1061_s13 = scalar_lea.vmem %s1179_s22, 256  ;;  %p1066_p0 = scmp.lt.s32.totalorder %s1179_s22, %s1179_s22 }
  0x3c   :  { %p1062_p13 = scmp.ne.s32.totalorder %s1179_s22, %s1061_s13  ;;  %p1067_p1 = scmp.lt.s32.totalorder %s1061_s13, %s1061_s13 }
  0x3e   :  { %p1068_p2 = por %p1067_p1, %p1066_p0 }
  0x40   :  { %p1069_p3 = pnand %p1068_p2, %p1062_p13 }
  0x42   :  { %1072 = shalt.err (!%p1069_p3)
}
  0x43   :  { %59 = dma.hbm_to_vmem [thread:$0]  %s1409_s3, 256, %s1179_s22, [#allocation9], %s1105_s1, %s1105_s1, %s1106_s15  }
  0x44   :  { %1095 = dma.done.wait [#allocation3], 512  }
  0x45   :  { %1096 = vsyncadd [#allocation3], 4294966784 }
  0x46   :  { %1097 = dma.done.wait [#allocation6], 256  }
  0x47   :  { %1098 = vsyncadd [#allocation6], 4294967040 }
  0x48   :  { %1099 = dma.done.wait [#allocation9], 256  }
  0x49   :  { %1100 = vsyncadd [#allocation9], 4294967040  ;;  %v1109_v0 = vmov 0.0   ;;  %vm1110_vm0 = vmmov 0   ;;  %v946_v1 = vld [vmem:[#allocation7] sm:$0xff]   ;;  %v1219_v2 = vld [vmem:[#allocation8] sm:$0xff]   ;;  %v200_v15 = vlaneseq }
  0x4a   :  { %870 = vmatprep.subr.bf16.mxu1 %v1109_v0  ;;  %874 = vmatprep.mubr.msk.bf16.mxu1 %vm1110_vm0, %v1109_v0  ;;  %vm118_vm1 = vcmask 130048   ;;  %v948_v3 = vld [vmem:[#allocation2] sm:$0xff]   ;;  %v949_v4 = vld [vmem:[#allocation2 + $0x8] sm:$0xff]   ;;  %v1224_v5 = vld [vmem:[#allocation8 + $0x8] sm:$0xff]   ;;  %vm219_vm2 = vcmask 261120   ;;  %v1111_v21 = vmov 1.0  }
  0x4b   :  { %860 = vmatprep.subr.bf16.mxu0 %v946_v1  ;;  %871 = vmatpush3.bf16.msra.mxu1 %v1219_v2  ;;  %v205_v6 = vld [vmem:[#allocation5] sm:$0xff]  ;;  %v201_v20 = vand.u32 127, %v200_v15  ;;  %v951_v51 = vld [vmem:[#allocation2 + $0x10] sm:$0xff]   ;;  %v952_v52 = vld [vmem:[#allocation2 + $0x18] sm:$0xff]   ;;  %s1113_s16 = smov 32   ;;  %vm785_vm4 = vcmask 523264  }
  0x4c   :  { %861 = vmatpush3.bf16.msra.mxu0 %v946_v1  ;;  %862 = vmatprep.mubr.msk.bf16.mxu0 %vm118_vm1, %v948_v3  ;;  %v206_v7 = vpack.c.bf16 %v205_v6, %v205_v6  ;;  %v1244_v8 = vld [vmem:[%s1410_s4] ss:$0 sm:$0xff]  ;;  %s1112_s4 = smov 96   ;;  %vm787_vm5 = vcmask 785408  }
  0x4d   :  { %872 = vmatprep.subr.bf16.mxu1 %v1109_v0  ;;  %886 = vmatprep.subr.bf16.mxu0 %v1109_v0  ;;  %vm202_vm3 = vcmp.lt.s32.totalorder %v201_v20, 96 }
  0x4e   :  { %v1251_v22 = vsel %vm202_vm3, 0.5, %v1111_v21  ;;  %v1254_v24 = vsel %vm202_vm3, 0.5, %v1109_v0 }
  0x4f   :  { %863 = vmatmul.mubr.msk.bf16.vlgmr.msra.gmra.mrb[0].mxu0 %vm118_vm1, %v949_v4  ;;  %873 = vmatpush3.bf16.msra.mxu1 %v1224_v5 }
  0x50   :  { %887 = vmatpush3.bf16.msra.mxu0 %v1219_v2  ;;  %878 = vmatprep.subr.bf16.mxu1 %v1109_v0 }
  0x51   :  { %888 = vmatprep.subr.bf16.mxu0 %v1109_v0  ;;  %866 = vmatprep.mubr.msk.bf16.mxu0 %vm118_vm1, %v951_v51 }
  0x52   :  { %875 = vmatmul.mubr.msk.bf16.vlgmr.msra.gmra.mrb[0].mxu1 %vm219_vm2, %v206_v7 }
  0x53   :  { %879 = vmatpush3.bf16.msra.mxu1 %v1219_v2  ;;  %882 = vmatprep.mubr.msk.bf16.mxu1 %vm1110_vm0, %v1109_v0 }
  0x54   :  { %880 = vmatprep.subr.bf16.mxu1 %v1109_v0  ;;  %889 = vmatpush3.bf16.msra.mxu0 %v1224_v5 }
  0x55   :  { %902 = vmatprep.subr.bf16.mxu0 %v1109_v0 }
  0x57   :  { %881 = vmatpush3.bf16.msra.mxu1 %v1224_v5  ;;  %867 = vmatmul.mubr.msk.bf16.gmra.mrb[4].mxu0 %vm118_vm1, %v952_v52 }
  0x58   :  { %894 = vmatprep.subr.bf16.mxu1 %v1109_v0  ;;  %890 = vmatprep.mubr.msk.bf16.mxu0 %vm1110_vm0, %v1109_v0 }
 0x122   :  { %v1246_v9 = vpop.f32.mrb[0].mxu0 }
 0x123   :  { %v165_v10 = vpop.f32.mrb[1].mxu0  ;;  %v174_v62 = vadd.f32 %v1246_v9, %v1244_v8 }
 0x124   :  { %v166_v11 = vadd.f32 %v1244_v8, %v165_v10  ;;  %v1249_v12 = vpop.f32.mrb[2].mxu0 }
 0x125   :  { %v168_v13 = vpop.f32.mrb[3].mxu0  ;;  %v257_v14 = vpop.f32.mrb[0].mxu1 }
 0x126   :  { %v263_v16 = vadd.f32 %v257_v14, %v166_v11  ;;  %v876_v17 = vpop.f32.mrb[1].mxu1  ;;  %v169_v37 = vadd.f32 %v1244_v8, %v168_v13 }
 0x127   :  { %v260_v18 = vpop.f32.mrb[2].mxu1 }
 0x128   :  { %953 = vtanh.f32 %v263_v16  ;;  %v877_v19 = vpop.f32.mrb[3].mxu1 }
 0x12a   :  { %v1288_v57 = vpop.f32.mrb[4].mxu0 }
 0x12b   :  { %v1290_v58 = vpop.f32.mrb[5].mxu0 }
 0x12c   :  { %v1292_v59 = vpop.f32.mrb[6].mxu0 }
 0x12d   :  { %v1294_v60 = vpop.f32.mrb[7].mxu0 }
 0x132   :  { %v954_v23 = vpop.eup %953 }
 0x133   :  { %v265_v25 = vmul.f32 %v954_v23, %v1251_v22  ;;  %v177_v23 = vadd.f32 %v1249_v12, %v1244_v8 }
 0x135   :  { %v266_v26 = vadd.f32 %v265_v25, %v1254_v24 }
 0x137   :  { %269 = vrot.lane.b32.xlu0 %v266_v26, %s1105_s1  ;;  %v267_v29 = vmul.f32 0.0, %v266_v26 }
 0x1a9   :  { %v270_v27 = vpop.permute.xlu0 %269 }
 0x1aa   :  { %v272_v28 = vmul.f32 %v270_v27, %v266_v26 }
 0x1ac   :  { %274 = vrot.lane.b32.xlu0 %v272_v28, %s1112_s4 }
 0x21e   :  { %v275_v30 = vpop.permute.xlu0 %274 }
 0x21f   :  { %v277_v31 = vadd.f32 %v275_v30, %v267_v29 }
 0x221   :  { %955 = vtanh.f32 %v277_v31 }
 0x22b   :  { %v956_v32 = vpop.eup %955 }
 0x22c   :  { %280 = vrot.lane.b32.xlu1 %v956_v32, %s1105_s1 }
 0x29e   :  { %v281_v33 = vpop.permute.xlu1 %280 }
 0x29f   :  { %v1261_v34 = vmul.f32 %v281_v33, %v266_v26 }
 0x2a1   :  { %v284_v35 = vpack.c.bf16 %v1261_v34, %v1261_v34 }
 0x2a3   :  { %286 = vrot.lane.b32.xlu1 %v284_v35, %s1105_s1 }
 0x315   :  { %v287_v36 = vpop.permute.xlu1 %286 }
 0x316   :  { %883 = vmatmul.mubr.msk.bf16.vlgmr.msra.gmra.mrb[4].mxu1 %vm219_vm2, %v287_v36 }
 0x317   :  { %895 = vmatpush3.bf16.msra.mxu1 %v1219_v2  ;;  %898 = vmatprep.mubr.msk.bf16.mxu1 %vm1110_vm0, %v1109_v0 }
 0x318   :  { %896 = vmatprep.subr.bf16.mxu1 %v1109_v0 }
 0x31b   :  { %897 = vmatpush3.bf16.msra.mxu1 %v1224_v5 }
 0x31c   :  { %910 = vmatprep.subr.bf16.mxu1 %v1109_v0 }
 0x3e9   :  { %v325_v38 = vpop.f32.mrb[4].mxu1 }
 0x3ea   :  { %v331_v39 = vadd.f32 %v325_v38, %v169_v37  ;;  %v884_v40 = vpop.f32.mrb[5].mxu1 }
 0x3eb   :  { %v328_v41 = vpop.f32.mrb[6].mxu1 }
 0x3ec   :  { %957 = vtanh.f32 %v331_v39  ;;  %v885_v42 = vpop.f32.mrb[7].mxu1 }
 0x3f6   :  { %v958_v43 = vpop.eup %957 }
 0x3f7   :  { %v333_v44 = vmul.f32 %v958_v43, %v1251_v22  ;;  %v182_v43 = vadd.f32 %v1244_v8, %v1290_v58 }
 0x3f9   :  { %v334_v45 = vadd.f32 %v333_v44, %v1254_v24 }
 0x3fb   :  { %337 = vrot.lane.b32.xlu0 %v334_v45, %s1105_s1  ;;  %v335_v48 = vmul.f32 %v334_v45, %v277_v31 }
 0x46d   :  { %v338_v46 = vpop.permute.xlu0 %337 }
 0x46e   :  { %v340_v47 = vmul.f32 %v338_v46, %v334_v45 }
 0x470   :  { %342 = vrot.lane.b32.xlu1 %v340_v47, %s1112_s4 }
 0x4e2   :  { %v343_v49 = vpop.permute.xlu1 %342 }
 0x4e3   :  { %v345_v50 = vadd.f32 %v343_v49, %v335_v48 }
 0x4e5   :  { %959 = vtanh.f32 %v345_v50 }
 0x4ef   :  { %v960_v53 = vpop.eup %959 }
 0x4f0   :  { %348 = vrot.lane.b32.xlu0 %v960_v53, %s1105_s1 }
 0x562   :  { %v349_v54 = vpop.permute.xlu0 %348 }
 0x563   :  { %v1283_v55 = vmul.f32 %v349_v54, %v334_v45 }
 0x565   :  { %v352_v56 = vpack.c.bf16 %v1283_v55, %v1283_v55 }
 0x567   :  { %354 = vrot.lane.b32.xlu1 %v352_v56, %s1105_s1 }
 0x5d9   :  { %v355_v61 = vpop.permute.xlu1 %354 }
 0x5da   :  { %891 = vmatmul.mubr.msk.bf16.vlgmr.msra.gmra.mrb[8].mxu0 %vm219_vm2, %v355_v61 }
 0x5db   :  { %903 = vmatpush3.bf16.msra.mxu0 %v1219_v2  ;;  %906 = vmatprep.mubr.msk.bf16.mxu0 %vm1110_vm0, %v1109_v0 }
 0x5dc   :  { %904 = vmatprep.subr.bf16.mxu0 %v1109_v0 }
 0x5df   :  { %905 = vmatpush3.bf16.msra.mxu0 %v1224_v5 }
 0x5e0   :  { %918 = vmatprep.subr.bf16.mxu0 %v1109_v0 }
 0x6ad   :  { %v393_v63 = vpop.f32.mrb[8].mxu0 }
 0x6ae   :  { %v399_v1 = vadd.f32 %v393_v63, %v174_v62  ;;  %v892_v3 = vpop.f32.mrb[9].mxu0 }
 0x6af   :  { %v396_v4 = vpop.f32.mrb[10].mxu0 }
 0x6b0   :  { %961 = vtanh.f32 %v399_v1  ;;  %v893_v6 = vpop.f32.mrb[11].mxu0  ;;  %v185_v4 = vadd.f32 %v1244_v8, %v1294_v60 }
 0x6ba   :  { %v962_v7 = vpop.eup %961 }
 0x6bb   :  { %v401_v10 = vmul.f32 %v962_v7, %v1251_v22 }
 0x6bd   :  { %v402_v11 = vadd.f32 %v401_v10, %v1254_v24 }
 0x6bf   :  { %405 = vrot.lane.b32.xlu0 %v402_v11, %s1105_s1  ;;  %v403_v15 = vmul.f32 %v402_v11, %v345_v50 }
 0x731   :  { %v406_v13 = vpop.permute.xlu0 %405 }
 0x732   :  { %v408_v14 = vmul.f32 %v406_v13, %v402_v11 }
 0x734   :  { %410 = vrot.lane.b32.xlu1 %v408_v14, %s1112_s4 }
 0x7a6   :  { %v411_v16 = vpop.permute.xlu1 %410 }
 0x7a7   :  { %v413_v9 = vadd.f32 %v411_v16, %v403_v15 }
 0x7a9   :  { %963 = vtanh.f32 %v413_v9 }
 0x7b3   :  { %v964_v17 = vpop.eup %963 }
 0x7b4   :  { %416 = vrot.lane.b32.xlu0 %v964_v17, %s1105_s1 }
 0x826   :  { %v417_v18 = vpop.permute.xlu0 %416 }
 0x827   :  { %v1310_v19 = vmul.f32 %v417_v18, %v402_v11 }
 0x829   :  { %v420_v20 = vpack.c.bf16 %v1310_v19, %v1310_v19 }
 0x82b   :  { %422 = vrot.lane.b32.xlu1 %v420_v20, %s1105_s1 }
 0x89d   :  { %v423_v21 = vpop.permute.xlu1 %422 }
 0x89e   :  { %899 = vmatmul.mubr.msk.bf16.vlgmr.msra.gmra.mrb[8].mxu1 %vm219_vm2, %v423_v21 }
 0x89f   :  { %911 = vmatpush3.bf16.msra.mxu1 %v1219_v2  ;;  %914 = vmatprep.mubr.msk.bf16.mxu1 %vm1110_vm0, %v1109_v0 }
 0x8a0   :  { %912 = vmatprep.subr.bf16.mxu1 %v1109_v0 }
 0x8a3   :  { %913 = vmatpush3.bf16.msra.mxu1 %v1224_v5 }
 0x8a4   :  { %926 = vmatprep.subr.bf16.mxu1 %v1109_v0 }
 0x971   :  { %v461_v25 = vpop.f32.mrb[8].mxu1 }
 0x972   :  { %v467_v26 = vadd.f32 %v461_v25, %v177_v23  ;;  %v900_v27 = vpop.f32.mrb[9].mxu1  ;;  %v190_v25 = vadd.f32 %v1288_v57, %v1244_v8 }
 0x973   :  { %v464_v28 = vpop.f32.mrb[10].mxu1 }
 0x974   :  { %965 = vtanh.f32 %v467_v26  ;;  %v901_v29 = vpop.f32.mrb[11].mxu1 }
 0x97e   :  { %v966_v30 = vpop.eup %965 }
 0x97f   :  { %v469_v31 = vmul.f32 %v966_v30, %v1251_v22 }
 0x981   :  { %v470_v32 = vadd.f32 %v469_v31, %v1254_v24 }
 0x983   :  { %473 = vrot.lane.b32.xlu0 %v470_v32, %s1105_s1  ;;  %v471_v36 = vmul.f32 %v470_v32, %v413_v9 }
 0x9f5   :  { %v474_v33 = vpop.permute.xlu0 %473 }
 0x9f6   :  { %v476_v35 = vmul.f32 %v474_v33, %v470_v32 }
 0x9f8   :  { %478 = vrot.lane.b32.xlu1 %v476_v35, %s1112_s4 }
 0xa6a   :  { %v479_v37 = vpop.permute.xlu1 %478 }
 0xa6b   :  { %v481_v12 = vadd.f32 %v479_v37, %v471_v36 }
 0xa6d   :  { %967 = vtanh.f32 %v481_v12 }
 0xa77   :  { %v968_v38 = vpop.eup %967 }
 0xa78   :  { %484 = vrot.lane.b32.xlu0 %v968_v38, %s1105_s1 }
 0xaea   :  { %v485_v39 = vpop.permute.xlu0 %484 }
 0xaeb   :  { %v1329_v40 = vmul.f32 %v485_v39, %v470_v32 }
 0xaed   :  { %v488_v41 = vpack.c.bf16 %v1329_v40, %v1329_v40 }
 0xaef   :  { %490 = vrot.lane.b32.xlu1 %v488_v41, %s1105_s1 }
 0xb61   :  { %v491_v42 = vpop.permute.xlu1 %490 }
 0xb62   :  { %907 = vmatmul.mubr.msk.bf16.vlgmr.msra.gmra.mrb[12].mxu0 %vm219_vm2, %v491_v42 }
 0xb63   :  { %919 = vmatpush3.bf16.msra.mxu0 %v1219_v2  ;;  %922 = vmatprep.mubr.msk.bf16.mxu0 %vm1110_vm0, %v1109_v0 }
 0xb64   :  { %920 = vmatprep.subr.bf16.mxu0 %v1109_v0 }
 0xb67   :  { %921 = vmatpush3.bf16.msra.mxu0 %v1224_v5 }
 0xc35   :  { %v529_v44 = vpop.f32.mrb[12].mxu0 }
 0xc36   :  { %v535_v45 = vadd.f32 %v529_v44, %v182_v43  ;;  %v908_v46 = vpop.f32.mrb[13].mxu0  ;;  %v193_v44 = vadd.f32 %v1292_v59, %v1244_v8 }
 0xc37   :  { %v532_v47 = vpop.f32.mrb[14].mxu0 }
 0xc38   :  { %969 = vtanh.f32 %v535_v45  ;;  %v909_v48 = vpop.f32.mrb[15].mxu0 }
 0xc42   :  { %v970_v49 = vpop.eup %969 }
 0xc43   :  { %v537_v50 = vmul.f32 %v970_v49, %v1251_v22 }
 0xc45   :  { %v538_v51 = vadd.f32 %v537_v50, %v1254_v24 }
 0xc47   :  { %541 = vrot.lane.b32.xlu0 %v538_v51, %s1105_s1  ;;  %v539_v54 = vmul.f32 %v538_v51, %v481_v12 }
 0xcb9   :  { %v542_v52 = vpop.permute.xlu0 %541 }
 0xcba   :  { %v544_v53 = vmul.f32 %v542_v52, %v538_v51 }
 0xcbc   :  { %546 = vrot.lane.b32.xlu1 %v544_v53, %s1112_s4 }
 0xd2e   :  { %v547_v56 = vpop.permute.xlu1 %546 }
 0xd2f   :  { %v549_v58 = vadd.f32 %v547_v56, %v539_v54 }
 0xd31   :  { %971 = vtanh.f32 %v549_v58 }
 0xd3b   :  { %v972_v61 = vpop.eup %971 }
 0xd3c   :  { %552 = vrot.lane.b32.xlu0 %v972_v61, %s1105_s1 }
 0xdae   :  { %v553_v62 = vpop.permute.xlu0 %552 }
 0xdaf   :  { %v1347_v63 = vmul.f32 %v553_v62, %v538_v51 }
 0xdb1   :  { %v556_v1 = vpack.c.bf16 %v1347_v63, %v1347_v63 }
 0xdb3   :  { %558 = vrot.lane.b32.xlu1 %v556_v1, %s1105_s1 }
 0xe25   :  { %v559_v3 = vpop.permute.xlu1 %558 }
 0xe26   :  { %915 = vmatmul.mubr.msk.bf16.vlgmr.msra.gmra.mrb[12].mxu1 %vm219_vm2, %v559_v3 }
 0xe27   :  { %927 = vmatpush3.bf16.msra.mxu1 %v1219_v2  ;;  %930 = vmatprep.mubr.msk.bf16.mxu1 %vm1110_vm0, %v1109_v0 }
 0xe28   :  { %928 = vmatprep.subr.bf16.mxu1 %v1109_v0 }
 0xe2b   :  { %929 = vmatpush3.bf16.msra.mxu1 %v1224_v5 }
 0xef9   :  { %v597_v6 = vpop.f32.mrb[12].mxu1 }
 0xefa   :  { %v603_v7 = vadd.f32 %v597_v6, %v185_v4  ;;  %v916_v10 = vpop.f32.mrb[13].mxu1 }
 0xefb   :  { %v600_v11 = vpop.f32.mrb[14].mxu1 }
 0xefc   :  { %973 = vtanh.f32 %v603_v7  ;;  %v917_v13 = vpop.f32.mrb[15].mxu1 }
 0xf06   :  { %v974_v14 = vpop.eup %973 }
 0xf07   :  { %v605_v15 = vmul.f32 %v974_v14, %v1251_v22 }
 0xf09   :  { %v606_v2 = vadd.f32 %v605_v15, %v1254_v24 }
 0xf0b   :  { %609 = vrot.lane.b32.xlu0 %v606_v2, %s1105_s1  ;;  %v607_v5 = vmul.f32 %v606_v2, %v549_v58 }
 0xf7d   :  { %v610_v16 = vpop.permute.xlu0 %609 }
 0xf7e   :  { %v612_v0 = vmul.f32 %v610_v16, %v606_v2 }
 0xf80   :  { %614 = vrot.lane.b32.xlu1 %v612_v0, %s1112_s4 }
 0xff2   :  { %v615_v9 = vpop.permute.xlu1 %614 }
 0xff3   :  { %v617_v60 = vadd.f32 %v615_v9, %v607_v5 }
 0xff5   :  { %975 = vtanh.f32 %v617_v60 }
 0xfff   :  { %v976_v17 = vpop.eup %975 }
0x1000   :  { %620 = vrot.lane.b32.xlu0 %v976_v17, %s1105_s1 }
0x1072   :  { %v621_v18 = vpop.permute.xlu0 %620 }
0x1073   :  { %v623_v20 = vmul.f32 %v621_v18, %v606_v2 }
0x1075   :  { %v624_v21 = vpack.c.bf16 %v623_v20, %v623_v20 }
0x1077   :  { %626 = vrot.lane.b32.xlu1 %v624_v21, %s1105_s1 }
0x10e9   :  { %v627_v23 = vpop.permute.xlu1 %626 }
0x10ea   :  { %923 = vmatmul.mubr.msk.bf16.vlgmr.msra.gmra.mrb[16].mxu0 %vm219_vm2, %v627_v23 }
0x11bd   :  { %v665_v26 = vpop.f32.mrb[16].mxu0 }
0x11be   :  { %v671_v27 = vadd.f32 %v665_v26, %v190_v25  ;;  %v924_v28 = vpop.f32.mrb[17].mxu0 }
0x11bf   :  { %v668_v29 = vpop.f32.mrb[18].mxu0 }
0x11c0   :  { %977 = vtanh.f32 %v671_v27  ;;  %v925_v30 = vpop.f32.mrb[19].mxu0 }
0x11ca   :  { %v978_v31 = vpop.eup %977 }
0x11cb   :  { %v673_v32 = vmul.f32 %v978_v31, %v1251_v22 }
0x11cd   :  { %v674_v33 = vadd.f32 %v673_v32, %v1254_v24 }
0x11cf   :  { %677 = vrot.lane.b32.xlu0 %v674_v33, %s1105_s1  ;;  %v675_v37 = vmul.f32 %v674_v33, %v617_v60 }
0x1241   :  { %v678_v35 = vpop.permute.xlu0 %677 }
0x1242   :  { %v680_v36 = vmul.f32 %v678_v35, %v674_v33 }
0x1244   :  { %682 = vrot.lane.b32.xlu1 %v680_v36, %s1112_s4 }
0x12b6   :  { %v683_v12 = vpop.permute.xlu1 %682 }
0x12b7   :  { %v685_v57 = vadd.f32 %v683_v12, %v675_v37 }
0x12b9   :  { %979 = vtanh.f32 %v685_v57 }
0x12c3   :  { %v980_v38 = vpop.eup %979 }
0x12c4   :  { %688 = vrot.lane.b32.xlu0 %v980_v38, %s1105_s1 }
0x1336   :  { %v689_v39 = vpop.permute.xlu0 %688 }
0x1337   :  { %v691_v41 = vmul.f32 %v689_v39, %v674_v33 }
0x1339   :  { %v692_v42 = vpack.c.bf16 %v691_v41, %v691_v41 }
0x133b   :  { %694 = vrot.lane.b32.xlu1 %v692_v42, %s1105_s1 }
0x13ad   :  { %v695_v43 = vpop.permute.xlu1 %694 }
0x13ae   :  { %931 = vmatmul.mubr.msk.bf16.vlgmr.msra.gmra.mrb[16].mxu1 %vm219_vm2, %v695_v43 }
0x1481   :  { %v733_v45 = vpop.f32.mrb[16].mxu1 }
0x1482   :  { %v739_v46 = vadd.f32 %v733_v45, %v193_v44  ;;  %v932_v47 = vpop.f32.mrb[17].mxu1 }
0x1483   :  { %v736_v48 = vpop.f32.mrb[18].mxu1 }
0x1484   :  { %981 = vtanh.f32 %v739_v46  ;;  %v933_v49 = vpop.f32.mrb[19].mxu1 }
0x148e   :  { %v982_v50 = vpop.eup %981 }
0x148f   :  { %v741_v51 = vmul.f32 %v982_v50, %v1251_v22 }
0x1491   :  { %v742_v52 = vadd.f32 %v741_v51, %v1254_v24 }
0x1493   :  { %745 = vrot.lane.b32.xlu0 %v742_v52, %s1105_s1  ;;  %v743_v8 = vmul.f32 %v742_v52, %v685_v57 }
0x1505   :  { %v746_v53 = vpop.permute.xlu0 %745 }
0x1506   :  { %v748_v54 = vmul.f32 %v746_v53, %v742_v52 }
0x1508   :  { %750 = vrot.lane.b32.xlu1 %v748_v54, %s1112_s4 }
0x150c   :  { %761 = vrot.lane.b32.xlu1 %v1261_v34, %s1105_s1 }
0x1510   :  { %773 = vrot.lane.b32.xlu1 %v1347_v63, %s1105_s1 }
0x1514   :  { %769 = vrot.lane.b32.xlu1 %v1329_v40, %s1113_s16 }
0x157a   :  { %v751_v59 = vpop.permute.xlu1 %750 }
0x157b   :  { %v753_v22 = vadd.f32 %v751_v59, %v743_v8 }
0x157d   :  { %983 = vtanh.f32 %v753_v22 }
0x157e   :  { %v762_v56 = vpop.permute.xlu1 %761 }
0x1582   :  { %v774_v34 = vpop.permute.xlu1 %773 }
0x1586   :  { %v770_v63 = vpop.permute.xlu1 %769 }
0x1587   :  { %v984_v24 = vpop.eup %983 }
0x1588   :  { %756 = vrot.lane.b32.xlu0 %v984_v24, %s1105_s1  ;;  %s1114_s1 = smov [#allocation10]  }
0x1589   :  { %s800_s17 = sshll.u32 %s1114_s1, 4  ;;  %s801_s17 = int_to_ptr.vmem [resolvable:$true] %s800_s17 }
0x158a   :  { %s1073_s18 = scalar_lea.vmem %s801_s17, 256  ;;  %p1078_p5 = scmp.lt.s32.totalorder %s801_s17, %s801_s17 }
0x158b   :  { %p1074_p4 = scmp.ne.s32.totalorder %s801_s17, %s1073_s18  ;;  %p1079_p6 = scmp.lt.s32.totalorder %s1073_s18, %s1073_s18 }
0x158c   :  { %765 = vrot.lane.b32.xlu0 %v1283_v55, %s1112_s4 }
0x158d   :  { %p1080_p7 = por %p1079_p6, %p1078_p5 }
0x158f   :  { %p1081_p8 = pnand %p1080_p7, %p1074_p4 }
0x1590   :  { %777 = vrot.lane.b32.xlu0 %v623_v20, %s1112_s4 }
0x15fa   :  { %v757_v58 = vpop.permute.xlu0 %756 }
0x15fb   :  { %v759_v61 = vmul.f32 %v757_v58, %v742_v52 }
0x15fd   :  { %781 = vrot.lane.b32.xlu0 %v759_v61, %s1113_s16 }
0x15fe   :  { %v766_v62 = vpop.permute.xlu0 %765 }
0x15ff   :  { %v784_v40 = vsel %vm219_vm2, %v762_v56, %v766_v62 }
0x1600   :  { %v786_v1 = vsel %vm785_vm4, %v784_v40, %v1310_v19 }
0x1601   :  { %v788_v3 = vsel %vm787_vm5, %v786_v1, %v770_v63 }
0x1602   :  { %792 = vst [vmem:[#allocation10] sm:$0xff] %v788_v3  ;;  %v778_v4 = vpop.permute.xlu0 %777 }
0x1603   :  { %v789_v55 = vsel %vm219_vm2, %v774_v34, %v778_v4 }
0x1604   :  { %v790_v6 = vsel %vm785_vm4, %v789_v55, %v691_v41 }
0x166f   :  { %v782_v7 = vpop.permute.xlu0 %781 }
0x1670   :  { %v791_v10 = vsel %vm787_vm5, %v790_v6, %v782_v7 }
0x1671   :  { %793 = vst [vmem:[#allocation10 + $0x8] sm:$0xff] %v791_v10 }
0x1672   :  { %1084 = shalt.err (!%p1081_p8)
}
0x1673   :  { %s1085_s22 = scalar_lea.hbm %s1411_s5, 256 }
0x1674   :  { %p1086_p9 = scmp.ne.s32.totalorder %s1411_s5, %s1085_s22  ;;  %p1089_p10 = scmp.lt.u32.totalorder %s1085_s22, %s1411_s5 }
0x1676   :  { %p1091_p11 = pnand %p1089_p10, %p1086_p9 }
0x1678   :  { %1094 = shalt.err (!%p1091_p11)
}
0x1679   :  { %803 = dma.vmem_to_hbm [thread:$0]  %s801_s17, 256, %s1411_s5, [#allocation4]  }
0x167a   :  { %1101 = dma.done.wait [#allocation4], 256  }
0x167b   :  { %1102 = vsyncadd [#allocation4], 4294967040 }
0x167c   :  { %807 = vsyncpa [#allocation3], 1 }
0x167d   :  { %808 = vsyncpa [#allocation6], 1 }
0x167e   :  { %809 = vsyncpa [#allocation9], 1 }
0x167f   :  { %810 = vsyncpa [#allocation4], 1 }

</bundles_post_ra>
